<compile_context>
chip_gen: v6e
topology: v6e:2x2x1
jax: 0.10.0
libtpu: 0.0.40
codegen_flags: <defaults>
</compile_context>

<pallas_src>
import functools

import jax
import jax.numpy as jnp
from jax import lax
from jax.experimental import pallas as pl
from jax.experimental.pallas import tpu as pltpu

_LANES = 128
_DEFAULT_BLOCK_BYTES = 8 * 1024 * 1024      # ~8 MiB of HBM traffic per grid step


def _largest_divisor(n, candidates):
    for c in candidates:
        if n % c == 0:
            return c
    raise ValueError(f"no divisor of {n} in {candidates}")


def _make_kernel(block_rows, slab_rows, acc_rows, valid_rows, nblocks, need_mask):
    nslabs = block_rows // slab_rows
    groups = slab_rows // acc_rows
    last = nblocks - 1
    last_base = last * block_rows            # static row offset of the last block

    def _reduce_slab(s):
        # (slab_rows,128) -> (groups, acc_rows, 128) is layout-preserving; the
        # axis-0 sum is pure vreg-wise VPU adds into acc_rows//8 vreg chains.
        return s.reshape(groups, acc_rows, _LANES).sum(axis=0)

    def kernel(x_ref, o_ref):
        si = pl.program_id(0)

        @pl.when(si == 0)
        def _init():
            o_ref[...] = jnp.zeros_like(o_ref)

        def _plain_body(i, acc):
            r0 = pl.multiple_of(i * slab_rows, slab_rows)
            s = x_ref[pl.ds(r0, slab_rows), :].astype(jnp.float32)
            return acc + _reduce_slab(s)

        def _run_plain():
            acc = lax.fori_loop(0, nslabs, _plain_body,
                                jnp.zeros((acc_rows, _LANES), jnp.float32))
            o_ref[...] += acc

        if not need_mask:
            _run_plain()
        else:
            # Steady state: pure load+add stream, no masking overhead.
            @pl.when(si != last)
            def _steady():
                _run_plain()

            # Only the (partial) last block pays for the row mask; rows past
            # the valid range contain unspecified data and are zeroed.
            @pl.when(si == last)
            def _tail():
                def body(i, acc):
                    r0 = pl.multiple_of(i * slab_rows, slab_rows)
                    s = x_ref[pl.ds(r0, slab_rows), :].astype(jnp.float32)
                    row_idx = (last_base + r0
                               + lax.broadcasted_iota(jnp.int32, (slab_rows, 1), 0))
                    s = jnp.where(row_idx < valid_rows, s, jnp.float32(0.0))
                    return acc + _reduce_slab(s)

                acc = lax.fori_loop(0, nslabs, body,
                                    jnp.zeros((acc_rows, _LANES), jnp.float32))
                o_ref[...] += acc

    return kernel


@functools.partial(jax.jit, static_argnames=("block_bytes",))
def reg_loss(out, *, block_bytes=_DEFAULT_BLOCK_BYTES):
    """loss = sum(out) / out.shape[0], computed in a Pallas TPU kernel."""
    b = out.shape[0]
    x = out.reshape(-1)                      # free bitcast of a contiguous array
    n = x.shape[0]

    itemsize = jnp.dtype(x.dtype).itemsize
    sub_align = max(8, 32 // itemsize)       # native sublane packing: 8 f32 / 16 bf16 / 32 int8

    rows = n // _LANES
    tail = n - rows * _LANES

    # Sub-128-element ragged tail: tiny, sum it on the XLA side.
    tail_sum = jnp.float32(0.0)
    if tail:
        tail_sum = jnp.sum(x[rows * _LANES:].astype(jnp.float32))

    if rows < sub_align:
        # Too small for a kernel launch to pay off: pure-JAX fallback.
        main_sum = (jnp.sum(x[: rows * _LANES].astype(jnp.float32))
                    if rows else jnp.float32(0.0))
        return (main_sum + tail_sum) / b

    if tail:
        # TODO(synk): when numel % 128 != 0 this prefix slice materializes one
        # HBM copy; a 1-D-block kernel with element-level tail masking would
        # avoid it entirely.
        xm = x[: rows * _LANES].reshape(rows, _LANES)
    else:
        xm = x.reshape(rows, _LANES)         # free bitcast, no copy

    # Block sizing: ~block_bytes of wire traffic per grid step, rounded to the
    # dtype's native packed-tile row alignment.
    default_rows = max(sub_align,
                       (block_bytes // (_LANES * itemsize)) // sub_align * sub_align)
    br = min(default_rows, (rows // sub_align) * sub_align)
    nblocks = pl.cdiv(rows, br)
    need_mask = (nblocks * br) != rows

    # Wide accumulator (up to (64,128) = 8 independent vreg chains) for VALU
    # ILP; slab_rows bounds per-iteration in-flight (converted) data.
    acc_rows = _largest_divisor(br, (64, 32, 16, 8))
    slab_rows = _largest_divisor(br, (8 * acc_rows, 4 * acc_rows, 2 * acc_rows, acc_rows))

    kernel = _make_kernel(br, slab_rows, acc_rows, rows, nblocks, need_mask)

    in_bytes = br * _LANES * itemsize
    vmem_limit = int(max(32 * 1024 * 1024, 2 * in_bytes + 8 * 1024 * 1024))

    partial = pl.pallas_call(
        kernel,
        out_shape=jax.ShapeDtypeStruct((acc_rows, _LANES), jnp.float32),
        grid_spec=pltpu.PrefetchScalarGridSpec(
            num_scalar_prefetch=0,
            grid=(nblocks,),
            in_specs=[pl.BlockSpec((br, _LANES), lambda i: (i, 0))],
            out_specs=pl.BlockSpec((acc_rows, _LANES), lambda i: (0, 0)),
        ),
        compiler_params=pltpu.CompilerParams(
            dimension_semantics=("arbitrary",),
            vmem_limit_bytes=vmem_limit,
        ),
    )(xm)

    # TODO(synk): on v7x a leading CORE_PARALLEL grid axis could split the
    # stream across both TensorCores if one core's DMA engines do not already
    # saturate HBM; kept single-stream per the perf review (plain "parallel"
    # did not shard, and the 2-way split was pure overhead on 1-TC chips).

    # Tiny finalize in JAX: collapse the (acc_rows, 128) partial and divide by B.
    return (jnp.sum(partial) + tail_sum) / b


if __name__ == "__main__":
    key = jax.random.PRNGKey(0)
    k1, k2, k3, k4, k5, k6 = jax.random.split(key, 6)

    # Primary test: shapes consistent with the module's usage (NCHW image).
    B, C, H, W = 2, 4, 16, 16
    img = jax.random.normal(k1, (B, C, H, W), dtype=jnp.float32)
    loss = jax.block_until_ready(reg_loss(img))
    ref = jnp.sum(img) / B
    assert jnp.allclose(loss, ref, rtol=1e-5, atol=1e-4), (loss, ref)

    # Multi-block with partial last block (in-kernel row masking path).
    img2 = jax.random.normal(k2, (2, 10, 16, 16), dtype=jnp.float32)   # 5120 elem -> 40 rows
    loss2 = jax.block_until_ready(reg_loss(img2, block_bytes=16 * _LANES * 4))
    ref2 = jnp.sum(img2) / img2.shape[0]
    assert jnp.allclose(loss2, ref2, rtol=1e-5, atol=1e-4), (loss2, ref2)

    # Multi-block accumulation, evenly divisible (no masking needed).
    img3 = jax.random.normal(k3, (4, 8, 32, 32), dtype=jnp.float32)    # 32768 elem -> 256 rows
    loss3 = jax.block_until_ready(reg_loss(img3, block_bytes=32 * _LANES * 4))
    ref3 = jnp.sum(img3) / img3.shape[0]
    assert jnp.allclose(loss3, ref3, rtol=1e-5, atol=1e-4), (loss3, ref3)

    # bf16 stays bf16 on the wire; accumulation is f32 in-kernel.
    img4 = jax.random.normal(k4, (B, C, H, W), dtype=jnp.bfloat16)
    loss4 = jax.block_until_ready(reg_loss(img4))
    ref4 = jnp.sum(img4.astype(jnp.float32)) / B
    assert jnp.allclose(loss4, ref4, rtol=1e-2, atol=1e-2), (loss4, ref4)

    # numel % 128 != 0: ragged tail summed JAX-side + masked last block.
    img5 = jax.random.normal(k5, (2, 3, 28, 28), dtype=jnp.float32)    # 4704 elem
    loss5 = jax.block_until_ready(reg_loss(img5))
    ref5 = jnp.sum(img5) / img5.shape[0]
    assert jnp.allclose(loss5, ref5, rtol=1e-5, atol=1e-4), (loss5, ref5)

    # Tiny tensor: pure-JAX fallback path.
    img6 = jax.random.normal(k6, (2, 3, 4, 4), dtype=jnp.float32)      # 96 elem
    loss6 = jax.block_until_ready(reg_loss(img6))
    ref6 = jnp.sum(img6) / img6.shape[0]
    assert jnp.allclose(loss6, ref6, rtol=1e-5, atol=1e-5), (loss6, ref6)

    print("KERNEL_OK")
</pallas_src>

<mosaic_0001>
module attributes {stable_mosaic.version = 11 : i64} {
  func.func @kernel(%arg0: i32, %arg1: memref<16x128xf32, #tpu.memory_space<vmem>>, %arg2: memref<16x128xf32, #tpu.memory_space<vmem>>) attributes {dimension_semantics = [#tpu.dimension_semantics<arbitrary>], iteration_bounds = array<i64: 1>, scalar_prefetch = 0 : i64, scratch_operands = 0 : i64, tpu.core_type = #tpu.core_type<tc>, window_params = [{transform_indices = @transform_0, window_bounds = array<i64: 16, 128>}, {pipeline_mode = #tpu.pipeline_mode<synchronous>, transform_indices = @transform_1, window_bounds = array<i64: 16, 128>}]} {
    %c0_i32 = arith.constant 0 : i32
    %0 = arith.cmpi eq, %arg0, %c0_i32 : i32
    %1 = arith.extui %0 : i1 to i32
    %c0_i32_0 = arith.constant 0 : i32
    %2 = arith.cmpi ne, %1, %c0_i32_0 : i32
    scf.if %2 {
      %cst_7 = arith.constant 0.000000e+00 : f32
      %14 = vector.broadcast %cst_7 : f32 to vector<16x128xf32>
      %c0_8 = arith.constant 0 : index
      %c0_9 = arith.constant 0 : index
      %15 = vector.load %arg2[%c0_8, %c0_9] : memref<16x128xf32, #tpu.memory_space<vmem>>, vector<16x128xf32>
      tpu.vector_store %arg2[%c0_8, %c0_9], %14 {strides = array<i32>} : memref<16x128xf32, #tpu.memory_space<vmem>>, vector<16x128xf32>,
    } else {
    }
    %cst = arith.constant 0.000000e+00 : f32
    %3 = vector.broadcast %cst : f32 to vector<16x128xf32>
    %c0_i32_1 = arith.constant 0 : i32
    %c16_i32 = arith.constant 16 : i32
    %4 = arith.muli %c0_i32_1, %c16_i32 : i32
    %5 = tpu.assume_multiple %4, 16 : i32
    %6 = arith.index_cast %5 : i32 to index
    %c0 = arith.constant 0 : index
    %7 = vector.load %arg1[%6, %c0] : memref<16x128xf32, #tpu.memory_space<vmem>>, vector<16x128xf32>
    %8 = vector.shape_cast %7 : vector<16x128xf32> to vector<1x16x128xf32>
    %cst_2 = arith.constant dense<0.000000e+00> : vector<16x128xf32>
    %9 = vector.multi_reduction <add>, %8, %cst_2 [0] : vector<1x16x128xf32> to vector<16x128xf32>
    %10 = arith.addf %3, %9 : vector<16x128xf32>
    %c1_i32 = arith.constant 1 : i32
    %c0_3 = arith.constant 0 : index
    %c0_4 = arith.constant 0 : index
    %11 = vector.load %arg2[%c0_3, %c0_4] : memref<16x128xf32, #tpu.memory_space<vmem>>, vector<16x128xf32>
    %12 = arith.addf %11, %10 : vector<16x128xf32>
    %c0_5 = arith.constant 0 : index
    %c0_6 = arith.constant 0 : index
    %13 = vector.load %arg2[%c0_5, %c0_6] : memref<16x128xf32, #tpu.memory_space<vmem>>, vector<16x128xf32>
    tpu.vector_store %arg2[%c0_5, %c0_6], %12 {strides = array<i32>} : memref<16x128xf32, #tpu.memory_space<vmem>>, vector<16x128xf32>,
    return
  }
  func.func @transform_0(%arg0: i32) -> (i32, i32) {
    %c0_i32 = arith.constant 0 : i32
    %c0_i32_0 = arith.constant 0 : i32
    return %arg0, %c0_i32 : i32, i32
  }
  func.func @transform_1(%arg0: i32) -> (i32, i32) {
    %c0_i32 = arith.constant 0 : i32
    %c0_i32_0 = arith.constant 0 : i32
    %c0_i32_1 = arith.constant 0 : i32
    return %c0_i32, %c0_i32_0 : i32, i32
  }
}

</mosaic_0001>

<bundles_post_ra>
// kernel: reg_loss.1
= control target key start
LH: loop header
LB: loop body
LE: loop exit
PB: predicated region body
PF: predicated region fallthrough
CT: control target
= control target key end

     0   :  { %s53_s0 = inlined_call_operand.vmem [shape: f32[16,128], index: 0, kind: input, shape index: {}]   ;;  %s54_s1 = inlined_call_operand.vmem [shape: f32[16,128], index: 1, kind: output, shape index: {}]  }
   0x1   :  { %v14_v0 = vld [vmem:[%s53_s0] sm:$0xff]  ;;  %v15_v1 = vld [vmem:[%s53_s0 + $0x8] sm:$0xff] }
   0x2   :  { %24 = vst [vmem:[%s54_s1] sm:$0xff] %v14_v0  ;;  %25 = vst [vmem:[%s54_s1 + $0x8] sm:$0xff] %v15_v1 }

</bundles_post_ra>
